<compile_context>
chip_gen: v5e
topology: v5e:2x2
jax: 0.10.0
libtpu: 0.0.40
codegen_flags: <defaults>
</compile_context>

<pallas_src>
import math

import jax
import jax.numpy as jnp
import numpy as np
from jax import lax
from jax.experimental import pallas as pl
from jax.experimental.pallas import tpu as pltpu


# -----------------------------------------------------------------------------
# Kernel 1: proxy-side key / value projections, one grid step per batch.
# -----------------------------------------------------------------------------
def _kv_kernel(p_ref,
               wk1, bk1, wk2, bk2,     # f_object (2x conv+bn+relu)
               wv, bv,                 # f_down   (1x conv+bn+relu)
               k_out, v_out):
    p = p_ref[0]                       # (HWp, Cin) bf16

    def lin_relu(a, w_ref, b_ref):
        y = jnp.dot(a, w_ref[...], preferred_element_type=jnp.float32) + b_ref[...]
        return jnp.maximum(y, 0.0)     # f32

    k = lin_relu(lin_relu(p, wk1, bk1).astype(jnp.bfloat16), wk2, bk2)  # (HWp, Kc)
    v = lin_relu(p, wv, bv)                                             # (HWp, Kc)
    k_out[0] = k.astype(k_out.dtype)
    v_out[0] = v.astype(v_out.dtype)


# -----------------------------------------------------------------------------
# Kernel 2: main OCR attention, one grid step per (batch, query-row tile).
# -----------------------------------------------------------------------------
def _ocr_main_kernel(x_ref, k_ref, v_ref,
                     wq1, bq1, wq2, bq2,        # f_pixel (2x conv+bn+relu)
                     wup, bup,                  # f_up    (1x conv+bn+relu)
                     wo_ctx, wo_feat, bo,       # conv_bn_dropout (split concat)
                     out_ref):
    x = x_ref[0]                       # (TQ,  Cin) bf16
    k = k_ref[0]                       # (HWp, Kc)  bf16
    v = v_ref[0]                       # (HWp, Kc)  bf16

    def lin_relu(a, w_ref, b_ref):
        y = jnp.dot(a, w_ref[...], preferred_element_type=jnp.float32) + b_ref[...]
        return jnp.maximum(y, 0.0)     # f32

    # query projection (two fused 1x1 conv+bn+relu)
    q = lin_relu(lin_relu(x, wq1, bq1).astype(jnp.bfloat16), wq2, bq2)  # (TQ, Kc) f32
    kc = q.shape[-1]

    # sim = q @ k^T without materializing a transposed copy of k
    sim = lax.dot_general(q.astype(jnp.bfloat16), k,
                          dimension_numbers=(((1,), (1,)), ((), ())),
                          preferred_element_type=jnp.float32) * (kc ** -0.5)

    # numerically-stable softmax over proxy axis, kept in f32
    sim = sim - jnp.max(sim, axis=-1, keepdims=True)
    e = jnp.exp(sim)
    attn = e * pl.reciprocal(jnp.sum(e, axis=-1, keepdims=True), approx=True)

    ctx = jnp.dot(attn.astype(jnp.bfloat16), v,
                  preferred_element_type=jnp.float32)                   # (TQ, Kc)
    ctx = lin_relu(ctx.astype(jnp.bfloat16), wup, bup)                  # (TQ, Cin)

    # conv_bn_dropout on concat([context, feats], channel) == split matmul
    out = (jnp.dot(ctx.astype(jnp.bfloat16), wo_ctx[...],
                   preferred_element_type=jnp.float32)
           + jnp.dot(x, wo_feat[...], preferred_element_type=jnp.float32)
           + bo[...])
    out_ref[0] = jnp.maximum(out, 0.0).astype(out_ref.dtype)


# -----------------------------------------------------------------------------
# Parameter construction: fold Conv1x1 (no bias) + BatchNorm(eval) into (W, b).
# -----------------------------------------------------------------------------
def _fused_conv_bn(key, cin, cout, eps=1e-5):
    k1, k2, k3, k4, k5 = jax.random.split(key, 5)
    w = jax.random.normal(k1, (cout, cin), jnp.float32) * (1.0 / math.sqrt(cin))
    gamma = jax.random.uniform(k2, (cout,), jnp.float32, 0.5, 1.5)
    beta = jax.random.normal(k3, (cout,), jnp.float32) * 0.1
    mean = jax.random.normal(k4, (cout,), jnp.float32) * 0.1
    var = jax.random.uniform(k5, (cout,), jnp.float32, 0.5, 1.5)
    scale = gamma / jnp.sqrt(var + eps)
    w_fused = (w * scale[:, None]).T           # (cin, cout), for x @ W
    b_fused = (beta - scale * mean)[None, :]   # (1, cout)
    return w_fused, b_fused


def make_params(key, in_channels, key_channels, out_channels):
    ks = jax.random.split(key, 8)
    wq1, bq1 = _fused_conv_bn(ks[0], in_channels, key_channels)
    wq2, bq2 = _fused_conv_bn(ks[1], key_channels, key_channels)
    wk1, bk1 = _fused_conv_bn(ks[2], in_channels, key_channels)
    wk2, bk2 = _fused_conv_bn(ks[3], key_channels, key_channels)
    wv, bv = _fused_conv_bn(ks[4], in_channels, key_channels)
    wup, bup = _fused_conv_bn(ks[5], key_channels, in_channels)
    # final conv acts on concat([context, feats]) -> split weight over the halves
    wo_full, bo = _fused_conv_bn(ks[6], 2 * in_channels, out_channels)
    wo_ctx = wo_full[:in_channels]
    wo_feat = wo_full[in_channels:]
    return dict(wq1=wq1, bq1=bq1, wq2=wq2, bq2=bq2,
                wk1=wk1, bk1=bk1, wk2=wk2, bk2=bk2,
                wv=wv, bv=bv, wup=wup, bup=bup,
                wo_ctx=wo_ctx, wo_feat=wo_feat, bo=bo)


# -----------------------------------------------------------------------------
# Tile-size helper: largest multiple of 16 (bf16 sublane tile) dividing HW.
# -----------------------------------------------------------------------------
def _pick_q_tile(hw, cap=512):
    for t in range(min(cap, hw), 15, -1):
        if hw % t == 0 and t % 16 == 0:
            return t
    return hw   # full spatial extent is always a legal (full-dim) block


# -----------------------------------------------------------------------------
# Wrapper: NCHW in / NCHW out (matching the PyTorch interface).
# -----------------------------------------------------------------------------
def spatial_ocr(feats_nchw, proxy_nchw, params, *, q_tile_cap=512):
    B, Cin, H, W = feats_nchw.shape
    _, _, Hp, Wp = proxy_nchw.shape
    HW, HWp = H * W, Hp * Wp
    Kc = params["wq2"].shape[-1]
    Cout = params["bo"].shape[-1]

    # channels-last flatten; MXU operands cast to bf16 (halves kernel DMA too)
    x = jnp.transpose(feats_nchw, (0, 2, 3, 1)).reshape(B, HW, Cin).astype(jnp.bfloat16)
    p = jnp.transpose(proxy_nchw, (0, 2, 3, 1)).reshape(B, HWp, Cin).astype(jnp.bfloat16)

    # matmul weights -> bf16, biases stay f32 (added post f32 accumulation)
    wf = {n: (params[n].astype(jnp.bfloat16) if n.startswith("w")
              else params[n].astype(jnp.float32)) for n in params}

    # ---- stage 1: proxy key / value projections (once per batch element) ----
    kv_names = ["wk1", "bk1", "wk2", "bk2", "wv", "bv"]
    kv_w = [wf[n] for n in kv_names]
    k_arr, v_arr = pl.pallas_call(
        _kv_kernel,
        out_shape=(jax.ShapeDtypeStruct((B, HWp, Kc), jnp.bfloat16),
                   jax.ShapeDtypeStruct((B, HWp, Kc), jnp.bfloat16)),
        grid_spec=pltpu.PrefetchScalarGridSpec(
            num_scalar_prefetch=0,
            grid=(B,),
            in_specs=[pl.BlockSpec((1, HWp, Cin), lambda b: (b, 0, 0))]
                     + [pl.BlockSpec(a.shape, lambda b: (0, 0)) for a in kv_w],
            out_specs=(pl.BlockSpec((1, HWp, Kc), lambda b: (b, 0, 0)),
                       pl.BlockSpec((1, HWp, Kc), lambda b: (b, 0, 0)))),
        compiler_params=pltpu.CompilerParams(dimension_semantics=("parallel",)),
    )(p, *kv_w)

    # ---- stage 2: attention + output, tiled over (batch, HW tile) ----------
    TQ = _pick_q_tile(HW, q_tile_cap)
    n_t = HW // TQ
    main_names = ["wq1", "bq1", "wq2", "bq2", "wup", "bup", "wo_ctx", "wo_feat", "bo"]
    main_w = [wf[n] for n in main_names]

    grid_spec = pltpu.PrefetchScalarGridSpec(
        num_scalar_prefetch=0,
        grid=(B, n_t),
        in_specs=[pl.BlockSpec((1, TQ, Cin), lambda b, t: (b, t, 0)),
                  pl.BlockSpec((1, HWp, Kc), lambda b, t: (b, 0, 0)),
                  pl.BlockSpec((1, HWp, Kc), lambda b, t: (b, 0, 0))]
                 + [pl.BlockSpec(a.shape, lambda b, t: (0, 0)) for a in main_w],
        out_specs=pl.BlockSpec((1, TQ, Cout), lambda b, t: (b, t, 0)),
    )

    out_flat = pl.pallas_call(
        _ocr_main_kernel,
        out_shape=jax.ShapeDtypeStruct((B, HW, Cout), jnp.float32),
        grid_spec=grid_spec,
        compiler_params=pltpu.CompilerParams(
            dimension_semantics=("parallel", "parallel"),
            vmem_limit_bytes=48 * 1024 * 1024),   # fits v7x's 64 MiB with headroom
    )(x, k_arr, v_arr, *main_w)

    return jnp.transpose(out_flat.reshape(B, H, W, Cout), (0, 3, 1, 2))


# -----------------------------------------------------------------------------
# Pure-JAX f32 reference for correctness checking.
# -----------------------------------------------------------------------------
def spatial_ocr_ref(feats_nchw, proxy_nchw, params):
    B, Cin, H, W = feats_nchw.shape
    _, _, Hp, Wp = proxy_nchw.shape
    x = jnp.transpose(feats_nchw, (0, 2, 3, 1)).reshape(B, H * W, Cin)
    p = jnp.transpose(proxy_nchw, (0, 2, 3, 1)).reshape(B, Hp * Wp, Cin)

    def lin_relu(a, w, b):
        return jnp.maximum(jnp.einsum("bnc,cd->bnd", a, w,
                                      precision=lax.Precision.HIGHEST) + b, 0.0)

    q = lin_relu(lin_relu(x, params["wq1"], params["bq1"]), params["wq2"], params["bq2"])
    k = lin_relu(lin_relu(p, params["wk1"], params["bk1"]), params["wk2"], params["bk2"])
    v = lin_relu(p, params["wv"], params["bv"])
    kc = q.shape[-1]
    sim = jnp.einsum("bqc,bkc->bqk", q, k,
                     precision=lax.Precision.HIGHEST) * (kc ** -0.5)
    attn = jax.nn.softmax(sim, axis=-1)
    ctx = jnp.einsum("bqk,bkc->bqc", attn, v, precision=lax.Precision.HIGHEST)
    ctx = lin_relu(ctx, params["wup"], params["bup"])
    out = jnp.maximum(
        jnp.einsum("bnc,cd->bnd", ctx, params["wo_ctx"],
                   precision=lax.Precision.HIGHEST)
        + jnp.einsum("bnc,cd->bnd", x, params["wo_feat"],
                     precision=lax.Precision.HIGHEST)
        + params["bo"], 0.0)
    Cout = out.shape[-1]
    return jnp.transpose(out.reshape(B, H, W, Cout), (0, 3, 1, 2))


if __name__ == "__main__":
    # small but lane-dense shapes: Cin = Kc = Cout = 128 (128-lane matmuls /
    # stores), HW = 1024 so the (B, HW//TQ) grid has several parallel tiles.
    B, Cin, Kc, Cout = 2, 128, 128, 128
    H = W = 32          # feats spatial  -> HW = 1024, TQ = 512 -> 2 tiles/batch
    Hp, Wp = 8, 1       # proxy (object regions) spatial

    key = jax.random.PRNGKey(0)
    k_feat, k_proxy, k_param = jax.random.split(key, 3)
    feats = jax.random.normal(k_feat, (B, Cin, H, W), jnp.float32)
    proxy = jax.random.normal(k_proxy, (B, Cin, Hp, Wp), jnp.float32)
    params = make_params(k_param, Cin, Kc, Cout)

    out = spatial_ocr(feats, proxy, params)
    out = jax.block_until_ready(out)

    ref = jax.block_until_ready(spatial_ocr_ref(feats, proxy, params))
    # tolerance accounts for bf16 MXU operands (f32 accumulation) vs f32 ref
    np.testing.assert_allclose(np.asarray(out), np.asarray(ref),
                               rtol=3e-2, atol=3e-2)

    print("KERNEL_OK")
</pallas_src>

<mosaic_0001>
module attributes {stable_mosaic.version = 11 : i64} {
  func.func @_kv_kernel(%arg0: i32, %arg1: memref<1x8x128xbf16, #tpu.memory_space<vmem>>, %arg2: memref<128x128xbf16, #tpu.memory_space<vmem>>, %arg3: memref<1x128xf32, #tpu.memory_space<vmem>>, %arg4: memref<128x128xbf16, #tpu.memory_space<vmem>>, %arg5: memref<1x128xf32, #tpu.memory_space<vmem>>, %arg6: memref<128x128xbf16, #tpu.memory_space<vmem>>, %arg7: memref<1x128xf32, #tpu.memory_space<vmem>>, %arg8: memref<1x8x128xbf16, #tpu.memory_space<vmem>>, %arg9: memref<1x8x128xbf16, #tpu.memory_space<vmem>>) attributes {dimension_semantics = [#tpu.dimension_semantics<parallel>], iteration_bounds = array<i64: 2>, scalar_prefetch = 0 : i64, scratch_operands = 0 : i64, tpu.core_type = #tpu.core_type<tc>, window_params = [{transform_indices = @transform_0, window_bounds = array<i64: 1, 8, 128>}, {pipeline_mode = #tpu.pipeline_mode<synchronous>, transform_indices = @transform_1, window_bounds = array<i64: 128, 128>}, {pipeline_mode = #tpu.pipeline_mode<synchronous>, transform_indices = @transform_2, window_bounds = array<i64: 1, 128>}, {pipeline_mode = #tpu.pipeline_mode<synchronous>, transform_indices = @transform_3, window_bounds = array<i64: 128, 128>}, {pipeline_mode = #tpu.pipeline_mode<synchronous>, transform_indices = @transform_4, window_bounds = array<i64: 1, 128>}, {pipeline_mode = #tpu.pipeline_mode<synchronous>, transform_indices = @transform_5, window_bounds = array<i64: 128, 128>}, {pipeline_mode = #tpu.pipeline_mode<synchronous>, transform_indices = @transform_6, window_bounds = array<i64: 1, 128>}, {transform_indices = @transform_7, window_bounds = array<i64: 1, 8, 128>}, {transform_indices = @transform_8, window_bounds = array<i64: 1, 8, 128>}]} {
    %c0 = arith.constant 0 : index
    %c0_0 = arith.constant 0 : index
    %c0_1 = arith.constant 0 : index
    %0 = vector.load %arg1[%c0, %c0_0, %c0_1] : memref<1x8x128xbf16, #tpu.memory_space<vmem>>, vector<1x8x128xbf16>
    %1 = vector.shape_cast %0 : vector<1x8x128xbf16> to vector<8x128xbf16>
    %c0_2 = arith.constant 0 : index
    %c0_3 = arith.constant 0 : index
    %2 = vector.load %arg2[%c0_2, %c0_3] : memref<128x128xbf16, #tpu.memory_space<vmem>>, vector<128x128xbf16>
    %cst = arith.constant dense<0.000000e+00> : vector<8x128xf32>
    %3 = tpu.matmul %1, %2, %cst {dimension_numbers = #tpu.dot_dimension_numbers<[1], [0], [0], [1], [0, 0, 1, 1], [], []>} : vector<8x128xbf16>, vector<128x128xbf16>, vector<8x128xf32> -> vector<8x128xf32>
    %c0_4 = arith.constant 0 : index
    %c0_5 = arith.constant 0 : index
    %4 = vector.load %arg3[%c0_4, %c0_5] : memref<1x128xf32, #tpu.memory_space<vmem>>, vector<1x128xf32>
    %5 = vector.broadcast %4 : vector<1x128xf32> to vector<8x128xf32>
    %6 = arith.addf %3, %5 : vector<8x128xf32>
    %cst_6 = arith.constant 0.000000e+00 : f32
    %7 = vector.broadcast %cst_6 : f32 to vector<8x128xf32>
    %8 = arith.maximumf %6, %7 : vector<8x128xf32>
    %9 = arith.truncf %8 : vector<8x128xf32> to vector<8x128xbf16>
    %c0_7 = arith.constant 0 : index
    %c0_8 = arith.constant 0 : index
    %10 = vector.load %arg4[%c0_7, %c0_8] : memref<128x128xbf16, #tpu.memory_space<vmem>>, vector<128x128xbf16>
    %cst_9 = arith.constant dense<0.000000e+00> : vector<8x128xf32>
    %11 = tpu.matmul %9, %10, %cst_9 {dimension_numbers = #tpu.dot_dimension_numbers<[1], [0], [0], [1], [0, 0, 1, 1], [], []>} : vector<8x128xbf16>, vector<128x128xbf16>, vector<8x128xf32> -> vector<8x128xf32>
    %c0_10 = arith.constant 0 : index
    %c0_11 = arith.constant 0 : index
    %12 = vector.load %arg5[%c0_10, %c0_11] : memref<1x128xf32, #tpu.memory_space<vmem>>, vector<1x128xf32>
    %13 = vector.broadcast %12 : vector<1x128xf32> to vector<8x128xf32>
    %14 = arith.addf %11, %13 : vector<8x128xf32>
    %cst_12 = arith.constant 0.000000e+00 : f32
    %15 = vector.broadcast %cst_12 : f32 to vector<8x128xf32>
    %16 = arith.maximumf %14, %15 : vector<8x128xf32>
    %c0_13 = arith.constant 0 : index
    %c0_14 = arith.constant 0 : index
    %17 = vector.load %arg6[%c0_13, %c0_14] : memref<128x128xbf16, #tpu.memory_space<vmem>>, vector<128x128xbf16>
    %cst_15 = arith.constant dense<0.000000e+00> : vector<8x128xf32>
    %18 = tpu.matmul %1, %17, %cst_15 {dimension_numbers = #tpu.dot_dimension_numbers<[1], [0], [0], [1], [0, 0, 1, 1], [], []>} : vector<8x128xbf16>, vector<128x128xbf16>, vector<8x128xf32> -> vector<8x128xf32>
    %c0_16 = arith.constant 0 : index
    %c0_17 = arith.constant 0 : index
    %19 = vector.load %arg7[%c0_16, %c0_17] : memref<1x128xf32, #tpu.memory_space<vmem>>, vector<1x128xf32>
    %20 = vector.broadcast %19 : vector<1x128xf32> to vector<8x128xf32>
    %21 = arith.addf %18, %20 : vector<8x128xf32>
    %cst_18 = arith.constant 0.000000e+00 : f32
    %22 = vector.broadcast %cst_18 : f32 to vector<8x128xf32>
    %23 = arith.maximumf %21, %22 : vector<8x128xf32>
    %24 = arith.truncf %16 : vector<8x128xf32> to vector<8x128xbf16>
    %c0_19 = arith.constant 0 : index
    %c0_20 = arith.constant 0 : index
    %c0_21 = arith.constant 0 : index
    %25 = vector.load %arg8[%c0_19, %c0_20, %c0_21] : memref<1x8x128xbf16, #tpu.memory_space<vmem>>, vector<1x8x128xbf16>
    %26 = vector.shape_cast %25 : vector<1x8x128xbf16> to vector<8x128xbf16>
    %27 = vector.shape_cast %24 : vector<8x128xbf16> to vector<1x8x128xbf16>
    tpu.vector_store %arg8[%c0_19, %c0_20, %c0_21], %27 {strides = array<i32>} : memref<1x8x128xbf16, #tpu.memory_space<vmem>>, vector<1x8x128xbf16>,
    %28 = arith.truncf %23 : vector<8x128xf32> to vector<8x128xbf16>
    %c0_22 = arith.constant 0 : index
    %c0_23 = arith.constant 0 : index
    %c0_24 = arith.constant 0 : index
    %29 = vector.load %arg9[%c0_22, %c0_23, %c0_24] : memref<1x8x128xbf16, #tpu.memory_space<vmem>>, vector<1x8x128xbf16>
    %30 = vector.shape_cast %29 : vector<1x8x128xbf16> to vector<8x128xbf16>
    %31 = vector.shape_cast %28 : vector<8x128xbf16> to vector<1x8x128xbf16>
    tpu.vector_store %arg9[%c0_22, %c0_23, %c0_24], %31 {strides = array<i32>} : memref<1x8x128xbf16, #tpu.memory_space<vmem>>, vector<1x8x128xbf16>,
    return
  }
  func.func @transform_0(%arg0: i32) -> (i32, i32, i32) {
    %c0_i32 = arith.constant 0 : i32
    %c0_i32_0 = arith.constant 0 : i32
    %c0_i32_1 = arith.constant 0 : i32
    return %arg0, %c0_i32, %c0_i32_0 : i32, i32, i32
  }
  func.func @transform_1(%arg0: i32) -> (i32, i32) {
    %c0_i32 = arith.constant 0 : i32
    %c0_i32_0 = arith.constant 0 : i32
    %c0_i32_1 = arith.constant 0 : i32
    return %c0_i32, %c0_i32_0 : i32, i32
  }
  func.func @transform_2(%arg0: i32) -> (i32, i32) {
    %c0_i32 = arith.constant 0 : i32
    %c0_i32_0 = arith.constant 0 : i32
    %c0_i32_1 = arith.constant 0 : i32
    return %c0_i32, %c0_i32_0 : i32, i32
  }
  func.func @transform_3(%arg0: i32) -> (i32, i32) {
    %c0_i32 = arith.constant 0 : i32
    %c0_i32_0 = arith.constant 0 : i32
    %c0_i32_1 = arith.constant 0 : i32
    return %c0_i32, %c0_i32_0 : i32, i32
  }
  func.func @transform_4(%arg0: i32) -> (i32, i32) {
    %c0_i32 = arith.constant 0 : i32
    %c0_i32_0 = arith.constant 0 : i32
    %c0_i32_1 = arith.constant 0 : i32
    return %c0_i32, %c0_i32_0 : i32, i32
  }
  func.func @transform_5(%arg0: i32) -> (i32, i32) {
    %c0_i32 = arith.constant 0 : i32
    %c0_i32_0 = arith.constant 0 : i32
    %c0_i32_1 = arith.constant 0 : i32
    return %c0_i32, %c0_i32_0 : i32, i32
  }
  func.func @transform_6(%arg0: i32) -> (i32, i32) {
    %c0_i32 = arith.constant 0 : i32
    %c0_i32_0 = arith.constant 0 : i32
    %c0_i32_1 = arith.constant 0 : i32
    return %c0_i32, %c0_i32_0 : i32, i32
  }
  func.func @transform_7(%arg0: i32) -> (i32, i32, i32) {
    %c0_i32 = arith.constant 0 : i32
    %c0_i32_0 = arith.constant 0 : i32
    %c0_i32_1 = arith.constant 0 : i32
    return %arg0, %c0_i32, %c0_i32_0 : i32, i32, i32
  }
  func.func @transform_8(%arg0: i32) -> (i32, i32, i32) {
    %c0_i32 = arith.constant 0 : i32
    %c0_i32_0 = arith.constant 0 : i32
    %c0_i32_1 = arith.constant 0 : i32
    return %arg0, %c0_i32, %c0_i32_0 : i32, i32, i32
  }
}

</mosaic_0001>

<bundles_post_ra>
// kernel: tpu_custom_call.1
= control target key start
LH: loop header
LB: loop body
LE: loop exit
PB: predicated region body
PF: predicated region fallthrough
CT: control target
= control target key end

     0   :  { %s1495_s0 = inlined_call_operand.hbm [shape: bf16[2,8,128], index: 0, kind: input, shape index: {}]   ;;  %s1496_s1 = inlined_call_operand.hbm [shape: bf16[128,128], index: 1, kind: input, shape index: {}]   ;;  %s1497_s2 = inlined_call_operand.vmem [shape: f32[1,128], index: 2, kind: input, shape index: {}]   ;;  %s1498_s3 = inlined_call_operand.hbm [shape: bf16[128,128], index: 3, kind: input, shape index: {}]   ;;  %s1499_s4 = inlined_call_operand.vmem [shape: f32[1,128], index: 4, kind: input, shape index: {}]   ;;  %s1500_s5 = inlined_call_operand.hbm [shape: bf16[128,128], index: 5, kind: input, shape index: {}]   ;;  %s1501_s6 = inlined_call_operand.vmem [shape: f32[1,128], index: 6, kind: input, shape index: {}]   ;;  %s1502_s7 = inlined_call_operand.hbm [shape: bf16[2,8,128], index: 7, kind: output, shape index: {0}]   ;;  %s1503_s8 = inlined_call_operand.hbm [shape: bf16[2,8,128], index: 8, kind: output, shape index: {1}]  }
   0x1   :  { %1504 = sst [smem:[#allocation18_spill]] %s1496_s1 }
   0x2   :  { %1505 = sst [smem:[#allocation19_spill]] %s1498_s3 }
   0x3   :  { %14 = vsyncpa [#allocation3], 0 }
   0x4   :  { %16 = vsyncpa [#allocation3 + $0x1], 0 }
   0x5   :  { %17 = vsyncpa [#allocation6], 0 }
   0x6   :  { %18 = vsyncpa [#allocation9], 0 }
   0x7   :  { %19 = vsyncpa [#allocation4], 0 }
   0x8   :  { %21 = vsyncpa [#allocation4 + $0x1], 0 }
   0x9   :  { %22 = vsyncpa [#allocation12], 0 }
   0xa   :  { %24 = vsyncpa [#allocation12 + $0x1], 0  ;;  %s1309_s27 = smov 0   ;;  %s1311_s28 = smov 0  }
   0xb   :  { %s1313_s29 = smov 0   ;;  %s1315_s30 = smov 0  }
   0xc LB: > { %s1506_s1 = sld [smem:[#allocation18_spill]]  ;;  %s1333_s12 = sadd.s32 4294967295, %s1257_s30   ;;  %s1257_s30 = sphi %s1315_s30, %s1518_s30   ;;  %s1253_s29 = sphi %s1313_s29, %s1517_s29   ;;  %s1249_s28 = sphi %s1311_s28, %s1516_s28   ;;  %s1245_s27 = sphi %s1309_s27, %s1515_s27  }
   0xd   : > { %p804_p0 = scmp.ge.s32.totalorder %s1257_s30, 1  ;;  %p51_p1 = scmp.eq.s32.totalorder %s1333_s12, 0 }
   0xe   : > { %p239_p2 = scmp.lt.s32.totalorder %s1257_s30, 3  ;;  %s1259_s14 = smov [#allocation5]  }
   0xf   : > { %s252_s15 = sshll.u32 %s1259_s14, 4  ;;  %s1508_s3 = sld [smem:[#allocation19_spill]]  ;;  %s253_s15 = int_to_ptr.vmem [resolvable:$true] %s252_s15 }
  0x10   : > { %p1338_p3 = pnand %p804_p0, %p239_p2  ;;  %s284_s22 = sshll.u32 %s1500_s5, 4  ;;  %s285_s22 = int_to_ptr.hbm [resolvable:$true] %s284_s22 }
  0x11   : > { %s1260_s23 = smov [#allocation7]   ;;  %s1261_s25 = smov 64  }
  0x12   : > { %s250_s11 = sshll.u32 %s1506_s1, 4  ;;  %p962_p4 = pneg %p1338_p3  ;;  %s251_s11 = int_to_ptr.hbm [resolvable:$true] %s250_s11 }
  0x13   : > { %s269_s24 = sshll.u32 %s1260_s23, 4  ;;  %s1262_s26 = smov 4   ;;  %s270_s24 = int_to_ptr.vmem [resolvable:$true] %s269_s24 }
  0x14   : > { %p1350_p6 = pnand %p962_p4, %p51_p1  ;;  %s1263_s9 = smov [#allocation8]  }
  0x15   : > { %s267_s18 = sshll.u32 %s1508_s3, 4  ;;  %s286_s10 = sshll.u32 %s1263_s9, 4  ;;  %s268_s18 = int_to_ptr.hbm [resolvable:$true] %s267_s18  ;;  %s287_s10 = int_to_ptr.vmem [resolvable:$true] %s286_s10 }
  0x16   : > { %965 = dma.hbm_to_vmem [thread:$0]  (!%p1350_p6), %s251_s11, 1024, %s253_s15, [#allocation6], %s1261_s25, %s1261_s25, %s1262_s26  }
  0x17   : > { %968 = dma.hbm_to_vmem [thread:$0]  (!%p1350_p6), %s268_s18, 1024, %s270_s24, [#allocation6], %s1261_s25, %s1261_s25, %s1262_s26  }
  0x18   : > { %971 = dma.hbm_to_vmem [thread:$0]  (!%p1350_p6), %s285_s22, 1024, %s287_s10, [#allocation9], %s1261_s25, %s1261_s25, %s1262_s26  }
  0x19   : > { %s803_s14 = sadd.s32 4294967294, %s1257_s30   ;;  %s1365_s16 = sadd.s32 1, %s1257_s30  }
  0x1a   : > { %s37_s17 = sadd.s32 1, %s1253_s29  ;;  %s34_s11 = ssub.s32 %s1257_s30, %s1365_s16 }
  0x1b   : > { %p44_p7 = scmp.ne.s32.totalorder %s1253_s29, %s1249_s28  ;;  %p35_p8 = scmp.eq.s32.totalorder %s34_s11, 0 }
  0x1c   : > { %p45_p9 = scmp.eq.s32.totalorder %s1257_s30, 0  ;;  %p50_p10 = scmp.ne.s32.totalorder %s1249_s28, %s1245_s27 }
  0x1d   : > { %p200_p11 = scmp.eq.s32.totalorder %s1333_s12, 1  ;;  %p206_p0 = scmp.eq.s32.totalorder %s803_s14, 1 }
  0x1e   : > { %s1377_s15 = scalar_select %p35_p8, %s1253_s29, %s37_s17  }
  0x1f   : > { %p1381_p12 = por %p51_p1, %p50_p10  ;;  %p1385_p13 = por %p200_p11, %p44_p7 }
  0x20   : > { %p46_p2 = por %p45_p9, %p44_p7  ;;  %s303_s20 = sand.u32 1, %s1253_s29  }
  0x21   : > { %p1390_p4 = por %p206_p0, %p50_p10  ;;  %p986_p6 = scmp.lt.s32.totalorder %s1257_s30, 2 }
  0x22   : > { %s809_s22 = sshll.u32 %s303_s20, 2  ;;  %s810_s23 = sshll.u32 %s1257_s30, 2 }
  0x23   : > { %s311_s26 = scalar_lea.hbm %s1495_s0, %s810_s23  ;;  %s307_s10 = scalar_lea.vmem [#allocation2], %s809_s22 }
  0x24   : > { %s313_s9 = sshll.u32 %s311_s26, 4  ;;  %s315_s17 = sshll.u32 %s307_s10, 4  ;;  %s314_s9 = int_to_ptr.hbm [resolvable:$true] %s313_s9  ;;  %s316_s17 = int_to_ptr.vmem [resolvable:$true] %s315_s17 }
  0x25   : > { %p1399_p8 = pnand %p986_p6, %p46_p2  ;;  %s304_s11 = scalar_lea.sflag [#allocation3], %s303_s20 }
  0x26   : > { %s1121_s1 = sshra.s32 %s314_s9, 4  ;;  %s1128_s22 = scalar_lea.hbm %s1495_s0, 8  ;;  %s1122_s1 = int_to_ptr.hbm [resolvable:$true] %s1121_s1 }
  0x27   : > { %s1123_s3 = scalar_lea.hbm %s1122_s1, 4  ;;  %p1125_p9 = pneg %p1399_p8 }
  0x28   : > { %p1124_p7 = scmp.ne.s32.totalorder %s1122_s1, %s1123_s3  ;;  %p1129_p0 = scmp.lt.s32.totalorder %s1122_s1, %s1495_s0 }
  0x29   : > { %p1130_p2 = scmp.lt.s32.totalorder %s1128_s22, %s1123_s3 }
  0x2a   : > { %p1126_p10 = pnand %p1125_p9, %p1124_p7 }
  0x2b   : > { %p1131_p6 = por %p1130_p2, %p1129_p0 }
  0x2c   : > { %p1127_p11 = pneg %p1126_p10 }
  0x2e   : > { %p1132_p5 = pnand %p1131_p6, %p1127_p11 }
  0x30   : > { %1135 = shalt.err (!%p1132_p5)
}
  0x31   : > { %975 = dma.hbm_to_vmem [thread:$0]  (!%p1399_p8), %s314_s9, 64, %s316_s17, %s304_s11  }
  0x32   : > { %324 = sbr.rel (%p1338_p3) target bundleno = 360 (0x168), region = 48  ;;  %s1416_s20 = sand.u32 (!%p1338_p3), 1, %s1249_s28  }
  0x33   : > { %s1419_s10 = sshll.u32 (!%p1338_p3), %s1416_s20, 2  ;;  %s327_s1 = scalar_lea.sflag (!%p1338_p3), [#allocation3], %s1416_s20 }
  0x34   : > { %s330_s3 = scalar_lea.vmem (!%p1338_p3), [#allocation2], %s1419_s10 }
  0x37   : > { %1224 = dma.done.wait (%p1381_p12), %s327_s1, 64  }
  0x38   : > { %1226 = vsyncadd (%p1381_p12), %s327_s1, 4294967232 }
  0x39   : > { %1228 = dma.done.wait (%p51_p1), [#allocation6], 2048  }
  0x3a   : > { %1230 = vsyncadd (%p51_p1), [#allocation6], 4294965248 }
  0x3b   : > { %1232 = dma.done.wait (%p51_p1), [#allocation9], 1024  }
  0x3c   : > { %1234 = vsyncadd (%p51_p1), [#allocation9], 4294966272  ;;  %v927_v0 = vld [vmem:[#allocation5 + $0x38] sm:$0xff]  ;;  %v926_v1 = vld [vmem:[#allocation5 + $0x30] sm:$0xff]  ;;  %s916_s14 = sshll.u32 %s1333_s12, 2  ;;  %s383_s22 = scalar_lea.vmem [#allocation11], %s1419_s10 }
  0x3d   : > { %453 = vmatpush.bf16.msra.mxu0 %v927_v0  ;;  %v943_v2 = vld [vmem:[#allocation8 + $0x38] sm:$0xff]  ;;  %v942_v4 = vld [vmem:[#allocation8 + $0x30] sm:$0xff]  ;;  %v925_v5 = vld [vmem:[#allocation5 + $0x28] sm:$0xff]  ;;  %s666_s24 = scalar_lea.hbm %s1503_s8, %s916_s14  ;;  %s668_s25 = sshll.u32 %s383_s22, 4  ;;  %s669_s25 = int_to_ptr.vmem [resolvable:$true] %s668_s25 }
  0x3e   : > { %v935_v3 = vld [vmem:[#allocation7 + $0x38] sm:$0xff]  ;;  %618 = vmatpush.bf16.msra.mxu2 %v943_v2  ;;  %v934_v6 = vld [vmem:[#allocation7 + $0x30] sm:$0xff]  ;;  %v941_v7 = vld [vmem:[#allocation8 + $0x28] sm:$0xff]  ;;  %s670_s26 = sshll.u32 %s666_s24, 4  ;;  %s642_s1 = scalar_lea.sflag [#allocation12], %s1416_s20  ;;  %s671_s26 = int_to_ptr.hbm [resolvable:$true] %s670_s26 }
  0x3f   : > { %536 = vmatpush.bf16.msra.mxu1 %v935_v3  ;;  %v924_v8 = vld [vmem:[#allocation5 + $0x20] sm:$0xff]  ;;  %v933_v9 = vld [vmem:[#allocation7 + $0x28] sm:$0xff]  ;;  %v923_v11 = vld [vmem:[#allocation5 + $0x18] sm:$0xff]  ;;  %s1171_s9 = scalar_lea.hbm %s1503_s8, 8 }
  0x40   : > { %v940_v10 = vld [vmem:[#allocation8 + $0x20] sm:$0xff]  ;;  %v939_v13 = vld [vmem:[#allocation8 + $0x18] sm:$0xff]  ;;  %v922_v14 = vld [vmem:[#allocation5 + $0x10] sm:$0xff] }
  0x41   : > { %454 = vmatpush.bf16.msra.mxu0 %v926_v1  ;;  %v932_v12 = vld [vmem:[#allocation7 + $0x20] sm:$0xff]  ;;  %v931_v15 = vld [vmem:[#allocation7 + $0x18] sm:$0xff]  ;;  %v938_v16 = vld [vmem:[#allocation8 + $0x10] sm:$0xff] }
  0x42   : > { %619 = vmatpush.bf16.msra.mxu2 %v942_v4  ;;  %v921_v17 = vld [vmem:[#allocation5 + $0x8] sm:$0xff]  ;;  %v930_v18 = vld [vmem:[#allocation7 + $0x10] sm:$0xff]  ;;  %v920_v20 = vld [vmem:[#allocation5] sm:$0xff] }
  0x43   : > { %537 = vmatpush.bf16.msra.mxu1 %v934_v6  ;;  %v937_v19 = vld [vmem:[#allocation8 + $0x8] sm:$0xff]  ;;  %v936_v21 = vld [vmem:[#allocation8] sm:$0xff]  ;;  %v384_v22 = vld [vmem:[%s330_s3] sm:$0xf]  ;;  %s1165_s3 = sshra.s32 %s671_s26, 4  ;;  %s1166_s3 = int_to_ptr.hbm [resolvable:$true] %s1165_s3 }
  0x44   : > { %v929_v23 = vld [vmem:[#allocation7 + $0x8] sm:$0xff]  ;;  %v928_v24 = vld [vmem:[#allocation7] sm:$0xff]  ;;  %v1028_v25 = vld [vmem:[%s1497_s2] ss:$0 sm:$0xff]  ;;  %s1167_s13 = scalar_lea.hbm %s1166_s3, 4  ;;  %p1172_p12 = scmp.lt.s32.totalorder %s1166_s3, %s1503_s8 }
  0x45   : > { %455 = vmatpush.bf16.msra.mxu0 %v925_v5  ;;  %v1029_v30 = vld [vmem:[%s1501_s6] ss:$0 sm:$0xff]  ;;  %p1168_p1 = scmp.ne.s32.totalorder %s1166_s3, %s1167_s13  ;;  %p1173_p8 = scmp.lt.s32.totalorder %s1171_s9, %s1167_s13 }
  0x46   : > { %620 = vmatpush.bf16.msra.mxu2 %v941_v7 }
  0x47   : > { %538 = vmatpush.bf16.msra.mxu1 %v933_v9  ;;  %p1169_p3 = pnand %p1168_p1, %p1385_p13  ;;  %p1174_p7 = por %p1173_p8, %p1172_p12 }
  0x49   : > { %456 = vmatpush.bf16.msra.mxu0 %v924_v8  ;;  %p1170_p5 = pneg %p1169_p3 }
  0x4a   : > { %621 = vmatpush.bf16.msra.mxu2 %v940_v10 }
  0x4b   : > { %539 = vmatpush.bf16.msra.mxu1 %v932_v12  ;;  %p1175_p9 = pnand %p1174_p7, %p1170_p5 }
  0x4d   : > { %457 = vmatpush.bf16.msra.mxu0 %v923_v11 }
  0x4e   : > { %622 = vmatpush.bf16.msra.mxu2 %v939_v13 }
  0x4f   : > { %540 = vmatpush.bf16.msra.mxu1 %v931_v15 }
  0x51   : > { %458 = vmatpush.bf16.msra.mxu0 %v922_v14 }
  0x52   : > { %623 = vmatpush.bf16.msra.mxu2 %v938_v16 }
  0x53   : > { %541 = vmatpush.bf16.msra.mxu1 %v930_v18 }
  0x55   : > { %459 = vmatpush.bf16.msra.mxu0 %v921_v17 }
  0x56   : > { %624 = vmatpush.bf16.msra.mxu2 %v937_v19 }
  0x57   : > { %542 = vmatpush.bf16.msra.mxu1 %v929_v23 }
  0x59   : > { %460 = vmatpush.bf16.msra.mxu0 %v920_v20 }
  0x5a   : > { %625 = vmatpush.bf16.msra.mxu2 %v936_v21 }
  0x5b   : > { %543 = vmatpush.bf16.msra.mxu1 %v928_v24 }
  0x5c   : > { %461 = vmatmul.bf16.vlgmr.msra.gmra.mxu0 %v384_v22 }
  0x5d   : > { %626 = vmatmul.bf16.vlgmr.msra.gmra.mxu2 %v384_v22 }
  0xd9   : > { %v462_v26 = vpop.f32.mrf.mxu0 }
  0xda   : > { %v463_v27 = vadd.f32 %v1028_v25, %v462_v26 }
  0xdc   : > { %v466_v28 = vmax.f32 %v463_v27, 0.0 }
  0xde   : > { %v467_v29 = vpack.c.bf16 %v466_v28, %v466_v28 }
  0xe0   : > { %544 = vmatmul.bf16.vlgmr.msra.gmra.mxu1 %v467_v29  ;;  %v627_v32 = vpop.f32.mrf.mxu2 }
  0xe1   : > { %v464_v31 = vpop.f32.mrf.mxu0  ;;  %v628_v33 = vadd.f32 %v1029_v30, %v627_v32 }
  0xe3   : > { %v631_v34 = vmax.f32 %v628_v33, 0.0 }
  0xe5   : > { %v634_v35 = vpack.c.bf16 %v631_v34, %v631_v34 }
  0xe7   : > { %635 = vst [vmem:[%s383_s22] sm:$0xf] %v634_v35 }
  0xe8   : > { %v629_v36 = vpop.f32.mrf.mxu2 }
  0xe9   : > { %1178 = shalt.err (!%p1175_p9)
}
  0xea   : > { %959 = dma.vmem_to_hbm [thread:$0]  (%p1385_p13), %s669_s25, 64, %s671_s26, %s642_s1   ;;  %v1030_v37 = vld [vmem:[%s1499_s4] ss:$0 sm:$0xff] }
  0xeb   : > { %s652_s18 = scalar_lea.hbm %s1502_s7, %s916_s14  ;;  %s376_s3 = scalar_lea.vmem [#allocation10], %s1419_s10 }
  0xec   : > { %s654_s13 = sshll.u32 %s376_s3, 4  ;;  %s656_s9 = sshll.u32 %s652_s18, 4  ;;  %s655_s13 = int_to_ptr.vmem [resolvable:$true] %s654_s13  ;;  %s657_s9 = int_to_ptr.hbm [resolvable:$true] %s656_s9 }
  0xed   : > { %s637_s25 = scalar_lea.sflag [#allocation4], %s1416_s20  ;;  %s1193_s26 = sshra.s32 %s657_s9, 4  ;;  %s1194_s26 = int_to_ptr.hbm [resolvable:$true] %s1193_s26 }
  0xee   : > { %s1195_s1 = scalar_lea.hbm %s1194_s26, 4  ;;  %s1199_s10 = scalar_lea.hbm %s1502_s7, 8 }
  0xef   : > { %p1196_p10 = scmp.ne.s32.totalorder %s1194_s26, %s1195_s1  ;;  %p1200_p2 = scmp.lt.s32.totalorder %s1194_s26, %s1502_s7 }
  0xf0   : > { %p1201_p6 = scmp.lt.s32.totalorder %s1199_s10, %s1195_s1 }
  0xf1   : > { %p1197_p11 = pnand %p1196_p10, %p1385_p13 }
  0xf2   : > { %p1202_p1 = por %p1201_p6, %p1200_p2 }
  0xf3   : > { %p1198_p0 = pneg %p1197_p11 }
  0xf5   : > { %p1203_p3 = pnand %p1202_p1, %p1198_p0 }
 0x15d   : > { %v545_v38 = vpop.f32.mrf.mxu1 }
 0x15e   : > { %v546_v39 = vadd.f32 %v1030_v37, %v545_v38 }
 0x160   : > { %v549_v40 = vmax.f32 %v546_v39, 0.0 }
 0x162   : > { %v632_v41 = vpack.c.bf16 %v549_v40, %v549_v40 }
 0x164   : > { %633 = vst [vmem:[%s376_s3] sm:$0xf] %v632_v41 }
 0x165   : > { %v547_v42 = vpop.f32.mrf.mxu1 }
 0x166   : > { %1206 = shalt.err (!%p1203_p3)
}
 0x167   : > { %958 = dma.vmem_to_hbm [thread:$0]  (%p1385_p13), %s655_s13, 64, %s657_s9, %s637_s25  }
 0x168 PF: > { %s682_s20 = sand.u32 1, %s1245_s27   ;;  %p1514_p5 = scmp.ge.s32.totalorder %s1257_s30, 2 }
 0x169   : > { %s683_s24 = scalar_lea.sflag [#allocation4], %s682_s20 }
 0x16a   : > { %p977_p12 = pnand %p1514_p5, %p1390_p4 }
 0x16c   : > { %p978_p8 = pneg %p977_p12 }
 0x16e   : > { %1236 = dma.done.wait (%p978_p8), %s683_s24, 64  }
 0x16f   : > { %1238 = vsyncadd (%p978_p8), %s683_s24, 4294967232  ;;  %s693_s22 = scalar_lea.sflag [#allocation12], %s682_s20 }
 0x170   : > { %1240 = dma.done.wait (%p978_p8), %s693_s22, 64  }
 0x171   : > { %1242 = vsyncadd (%p978_p8), %s693_s22, 4294967232  ;;  %p27_p13 = scmp.ge.s32.totalorder %s1365_s16, 4   ;;  %s1515_s27 = smov %s1249_s28 }
 0x172   : > { %s1516_s28 = smov %s1253_s29  ;;  %s1517_s29 = smov %s1377_s15 }
 0x173   : > { %s1518_s30 = smov %s1365_s16  ;;  %29 = sbr.rel (!%p27_p13) target bundleno = 12 (0xc), region = 122 }
 0x178   :  { %699 = vsyncpa [#allocation3], 1 }
 0x179   :  { %701 = vsyncpa [#allocation3 + $0x1], 1 }
 0x17a   :  { %702 = vsyncpa [#allocation6], 1 }
 0x17b   :  { %703 = vsyncpa [#allocation9], 1 }
 0x17c   :  { %704 = vsyncpa [#allocation4], 1 }
 0x17d   :  { %706 = vsyncpa [#allocation4 + $0x1], 1 }
 0x17e   :  { %707 = vsyncpa [#allocation12], 1 }
 0x17f   :  { %709 = vsyncpa [#allocation12 + $0x1], 1 }

</bundles_post_ra>
